<compile_context>
chip_gen: v5e
topology: v5e:2x2
jax: 0.10.0
libtpu: 0.0.40
codegen_flags: <defaults>
</compile_context>

<pallas_src>
import math
import functools

import jax
import jax.numpy as jnp
from jax.experimental import pallas as pl
from jax.experimental.pallas import tpu as pltpu

_LN_EPS = 1e-5


def _layer_norm(v, gamma, beta):
    """LayerNorm over the last axis, f32 statistics (matches F.layer_norm)."""
    mu = jnp.mean(v, axis=-1, keepdims=True)
    c = v - mu
    var = jnp.mean(c * c, axis=-1, keepdims=True)
    return c * jax.lax.rsqrt(var + _LN_EPS) * gamma + beta


def _vmem_limit_bytes():
    """Scoped-VMEM request sized per TPU generation (v7x: 64 MiB physical/TC)."""
    try:
        cap = pltpu.get_tpu_info().vmem_capacity_bytes
        return int(min(cap * 3 // 4, 96 * 1024 * 1024))
    except Exception:
        return 48 * 1024 * 1024


def _attn_block_kernel(x_ref, g1_ref, bt1_ref, wqkv_ref, bqkv_ref,
                       wo_ref, bo_ref, y_ref,
                       q_s, k_s, v_s, ctx_s, mask_s,
                       *, n_head, compute_dtype):
    """Grid = (batch b, head h).  Computes y = x + c_proj(causal_attn(ln_1(x))).

    h==0  : LN + fused lane-dense QKV projection + causal mask into scratch.
    each h: per-head (T,T) logits -> softmax (deferred norm) -> ctx scratch.
    h==H-1: single lane-dense (T,C)@(C,C) output projection + residual,
            output block written exactly once.
    """
    H = n_head
    h = pl.program_id(1)
    T = x_ref.shape[1]
    C = x_ref.shape[2]
    D = C // H

    @pl.when(h == 0)
    def _():
        # Additive causal mask, built once per batch block (megacore-safe).
        row = jax.lax.broadcasted_iota(jnp.int32, (T, T), 0)
        col = jax.lax.broadcasted_iota(jnp.int32, (T, T), 1)
        mask_s[...] = jnp.where(col <= row, 0.0, -1e30).astype(jnp.float32)

        # ln_1 once per batch, then one lane-dense (T,C)@(C,3C) QKV matmul.
        x = x_ref[0]                                             # (T, C) f32
        xn = _layer_norm(x, g1_ref[...], bt1_ref[...]).astype(compute_dtype)
        qkv = jnp.dot(xn, wqkv_ref[...],
                      preferred_element_type=jnp.float32) + bqkv_ref[...]
        qkv = qkv.astype(compute_dtype)                          # (T, 3C)

        # Static unroll: split into head-major scratches (no dynamic lane
        # slicing, no relayout of the whole tensor at once).
        for hd in range(H):
            q_s[hd] = qkv[:, hd * D:(hd + 1) * D]
            k_s[hd] = qkv[:, C + hd * D:C + (hd + 1) * D]
            v_s[hd] = qkv[:, 2 * C + hd * D:2 * C + (hd + 1) * D]

    # --- per-head attention (only a (T,T) tile live, not (H,T,T)) ---
    q = q_s[h]                                                   # (T, D) bf16
    k = k_s[h]
    v = v_s[h]

    # logits[t, s] = q[t] . k[s]  (1/sqrt(D) already folded into Wq/bq).
    logits = jax.lax.dot_general(
        q, k, dimension_numbers=(((1,), (1,)), ((), ())),
        preferred_element_type=jnp.float32)                      # (T, T) f32
    logits = logits + mask_s[...]

    # Numerically stable softmax with deferred normalization.
    m = jnp.max(logits, axis=-1, keepdims=True)
    p = jnp.exp(logits - m)
    denom = jnp.sum(p, axis=-1, keepdims=True)
    # attn_dropout: identity (eval mode, p = 0)

    ctx = jnp.dot(p.astype(compute_dtype), v,
                  preferred_element_type=jnp.float32)            # (T, D)
    ctx = ctx * pl.reciprocal(denom, approx=True)                # T*D mults
    ctx_s[h] = ctx.astype(compute_dtype)

    @pl.when(h == H - 1)
    def _():
        # Gather heads (static concat) and do ONE lane-dense output projection.
        ctx_flat = jnp.concatenate([ctx_s[i] for i in range(H)], axis=-1)  # (T,C)
        out = jnp.dot(ctx_flat, wo_ref[...],
                      preferred_element_type=jnp.float32) + bo_ref[...]
        # proj_dropout: identity (eval mode, p = 0)
        y_ref[0] = (x_ref[0] + out).astype(y_ref.dtype)


def _mlp_block_kernel(y_ref, g2_ref, bt2_ref, wfc_ref, bfc_ref,
                      wpr_ref, bpr_ref, o_ref, *, compute_dtype):
    """One grid step = a tile of rows of the flattened (B*T, C) activations.
    Computes  y + c_proj(gelu(c_fc(ln_2(y)))).  Weights are VMEM-resident
    (constant index_map)."""
    y = y_ref[...]                                  # (R, C) f32
    yn = _layer_norm(y, g2_ref[...], bt2_ref[...])

    hidden = jnp.dot(yn.astype(compute_dtype), wfc_ref[...],
                     preferred_element_type=jnp.float32) + bfc_ref[...]   # (R, 4C)
    # TODO(synk): PyTorch nn.GELU() default is the exact erf form; tanh
    # approximation used here (EUP-friendly, max deviation < 1e-3).
    hidden = jax.nn.gelu(hidden, approximate=True)

    out = jnp.dot(hidden.astype(compute_dtype), wpr_ref[...],
                  preferred_element_type=jnp.float32) + bpr_ref[...]      # (R, C)
    # mlp dropout: identity (eval mode, p = 0)
    o_ref[...] = (y + out).astype(o_ref.dtype)


def _pick_row_tile(n_rows):
    for r in (512, 256, 128, 64, 32, 16, 8):
        if n_rows % r == 0:
            return r
    return n_rows


def gpt2_block_forward(x, params, n_head, *, compute_dtype=jnp.bfloat16):
    """Full GPT-2 Block forward: x + attn(ln_1(x)), then + mlp(ln_2(.)).

    x: (B, T, C) f32.  params uses PyTorch Linear convention W: (out, in)."""
    B, T, C = x.shape
    H = n_head
    assert C % H == 0
    D = C // H
    scale = 1.0 / math.sqrt(D)
    f32 = jnp.float32
    vmem_limit = _vmem_limit_bytes()

    # --- one-time wrapper-side weight preprocessing (no .T inside kernels) ---
    # Fused QKV weight (in, out) with the 1/sqrt(D) scale folded into the Q part.
    w_attn_t = params["w_attn"].T.astype(f32)                     # (C, 3C)
    scale_vec = jnp.concatenate(
        [jnp.full((C,), scale, dtype=f32), jnp.ones((2 * C,), dtype=f32)])
    w_qkv = (w_attn_t * scale_vec[None, :]).astype(compute_dtype)  # (C, 3C)
    b_qkv = (params["b_attn"].astype(f32) * scale_vec).reshape(1, 3 * C)

    w_proj = params["w_proj"].T.astype(compute_dtype)             # (C, C) (in,out)
    b_proj = params["b_proj"].reshape(1, C).astype(f32)

    g1 = params["ln1_g"].reshape(1, C).astype(f32)
    bt1 = params["ln1_b"].reshape(1, C).astype(f32)
    g2 = params["ln2_g"].reshape(1, C).astype(f32)
    bt2 = params["ln2_b"].reshape(1, C).astype(f32)

    wfc = params["w_fc"].T.astype(compute_dtype)                  # (C, 4C)
    bfc = params["b_fc"].reshape(1, 4 * C).astype(f32)
    wpr = params["w_pr"].T.astype(compute_dtype)                  # (4C, C)
    bpr = params["b_pr"].reshape(1, C).astype(f32)

    # --- kernel 1: y1 = x + c_proj(causal_attn(ln_1(x))) , grid = (B, H) ---
    attn_kernel = functools.partial(
        _attn_block_kernel, n_head=H, compute_dtype=compute_dtype)
    const2 = lambda b, h: (0, 0)
    y1 = pl.pallas_call(
        attn_kernel,
        out_shape=jax.ShapeDtypeStruct((B, T, C), x.dtype),
        grid_spec=pltpu.PrefetchScalarGridSpec(
            num_scalar_prefetch=0,
            grid=(B, H),
            in_specs=[
                pl.BlockSpec((1, T, C), lambda b, h: (b, 0, 0)),  # x (resident over h)
                pl.BlockSpec((1, C), const2),                     # ln1 gamma
                pl.BlockSpec((1, C), const2),                     # ln1 beta
                pl.BlockSpec((C, 3 * C), const2),                 # W_qkv (VMEM-resident)
                pl.BlockSpec((1, 3 * C), const2),                 # b_qkv
                pl.BlockSpec((C, C), const2),                     # W_proj
                pl.BlockSpec((1, C), const2),                     # b_proj
            ],
            out_specs=pl.BlockSpec((1, T, C), lambda b, h: (b, 0, 0)),
            scratch_shapes=[
                pltpu.VMEM((H, T, D), compute_dtype),             # q (head-major)
                pltpu.VMEM((H, T, D), compute_dtype),             # k
                pltpu.VMEM((H, T, D), compute_dtype),             # v
                pltpu.VMEM((H, T, D), compute_dtype),             # ctx
                pltpu.VMEM((T, T), jnp.float32),                  # additive causal mask
            ],
        ),
        compiler_params=pltpu.CompilerParams(
            dimension_semantics=("parallel", "arbitrary"),
            vmem_limit_bytes=vmem_limit),
    )(x, g1, bt1, w_qkv, b_qkv, w_proj, b_proj)

    # --- kernel 2: y2 = y1 + c_proj(gelu(c_fc(ln_2(y1)))) , row-tiled grid ---
    BT = B * T
    R = _pick_row_tile(BT)
    y1_flat = y1.reshape(BT, C)
    mlp_kernel = functools.partial(_mlp_block_kernel, compute_dtype=compute_dtype)
    const1 = lambda i: (0, 0)
    y2_flat = pl.pallas_call(
        mlp_kernel,
        out_shape=jax.ShapeDtypeStruct((BT, C), x.dtype),
        grid_spec=pltpu.PrefetchScalarGridSpec(
            num_scalar_prefetch=0,
            grid=(BT // R,),
            in_specs=[
                pl.BlockSpec((R, C), lambda i: (i, 0)),           # y1 rows
                pl.BlockSpec((1, C), const1),                     # ln2 gamma
                pl.BlockSpec((1, C), const1),                     # ln2 beta
                pl.BlockSpec((C, 4 * C), const1),                 # W_fc (resident)
                pl.BlockSpec((1, 4 * C), const1),                 # b_fc
                pl.BlockSpec((4 * C, C), const1),                 # W_proj2 (resident)
                pl.BlockSpec((1, C), const1),                     # b_proj2
            ],
            out_specs=pl.BlockSpec((R, C), lambda i: (i, 0)),
        ),
        compiler_params=pltpu.CompilerParams(
            dimension_semantics=("parallel",),
            vmem_limit_bytes=vmem_limit),
    )(y1_flat, g2, bt2, wfc, bfc, wpr, bpr)

    return y2_flat.reshape(B, T, C)


def gpt2_block_ref(x, params, n_head):
    """Pure-JAX f32 reference matching the PyTorch Block.forward (eval mode)."""
    B, T, C = x.shape
    D = C // n_head

    def layer_norm(v, g, b):
        mu = jnp.mean(v, axis=-1, keepdims=True)
        var = jnp.mean((v - mu) ** 2, axis=-1, keepdims=True)
        return (v - mu) / jnp.sqrt(var + _LN_EPS) * g + b

    # attention branch
    xn = layer_norm(x, params["ln1_g"], params["ln1_b"])
    qkv = xn @ params["w_attn"].T + params["b_attn"]
    q, k, v = jnp.split(qkv, 3, axis=-1)
    q = q.reshape(B, T, n_head, D).transpose(0, 2, 1, 3)
    k = k.reshape(B, T, n_head, D).transpose(0, 2, 1, 3)
    v = v.reshape(B, T, n_head, D).transpose(0, 2, 1, 3)
    att = jnp.einsum("bhtd,bhsd->bhts", q, k) / math.sqrt(D)
    mask = jnp.tril(jnp.ones((T, T), dtype=bool))
    att = jnp.where(mask[None, None], att, -jnp.inf)
    att = jax.nn.softmax(att, axis=-1)
    ctx = jnp.einsum("bhts,bhsd->bhtd", att, v)
    ctx = ctx.transpose(0, 2, 1, 3).reshape(B, T, C)
    x = x + ctx @ params["w_proj"].T + params["b_proj"]

    # mlp branch (PyTorch nn.GELU() default = exact erf form)
    xn = layer_norm(x, params["ln2_g"], params["ln2_b"])
    hidden = jax.nn.gelu(xn @ params["w_fc"].T + params["b_fc"], approximate=False)
    x = x + hidden @ params["w_pr"].T + params["b_pr"]
    return x


if __name__ == "__main__":
    # Small config: batch=2, seq=8, n_embed=32, n_head=4, bias=True, dropout=0.
    B, T, C, n_head = 2, 8, 32, 4

    key = jax.random.PRNGKey(0)
    ks = jax.random.split(key, 13)

    x = jax.random.normal(ks[0], (B, T, C), dtype=jnp.float32)
    params = {
        "ln1_g": 1.0 + 0.1 * jax.random.normal(ks[1], (C,), dtype=jnp.float32),
        "ln1_b": 0.1 * jax.random.normal(ks[2], (C,), dtype=jnp.float32),
        "w_attn": 0.02 * jax.random.normal(ks[3], (3 * C, C), dtype=jnp.float32),
        "b_attn": 0.02 * jax.random.normal(ks[4], (3 * C,), dtype=jnp.float32),
        "w_proj": 0.02 * jax.random.normal(ks[5], (C, C), dtype=jnp.float32),
        "b_proj": 0.02 * jax.random.normal(ks[6], (C,), dtype=jnp.float32),
        "ln2_g": 1.0 + 0.1 * jax.random.normal(ks[7], (C,), dtype=jnp.float32),
        "ln2_b": 0.1 * jax.random.normal(ks[8], (C,), dtype=jnp.float32),
        "w_fc": 0.02 * jax.random.normal(ks[9], (4 * C, C), dtype=jnp.float32),
        "b_fc": 0.02 * jax.random.normal(ks[10], (4 * C,), dtype=jnp.float32),
        "w_pr": 0.02 * jax.random.normal(ks[11], (C, 4 * C), dtype=jnp.float32),
        "b_pr": 0.02 * jax.random.normal(ks[12], (C,), dtype=jnp.float32),
    }

    fwd = jax.jit(functools.partial(gpt2_block_forward, n_head=n_head))
    out = jax.block_until_ready(fwd(x, params))

    ref = gpt2_block_ref(x, params, n_head)
    assert out.shape == (B, T, C)
    # bf16 matmul inputs + approx reciprocal + tanh-GELU vs exact f32 reference.
    assert jnp.allclose(out, ref, atol=1e-2, rtol=1e-2), "mismatch vs reference"

    # TODO(synk): all Dropout layers (attn/proj/mlp) are identity here (p=0 /
    # eval mode); training-mode dropout would use pltpu.prng_random_bits.
    print("KERNEL_OK")
</pallas_src>

<mosaic_0001>
module attributes {stable_mosaic.version = 11 : i64} {
  func.func @_mlp_block_kernel(%arg0: i32, %arg1: memref<16x32xf32, #tpu.memory_space<vmem>>, %arg2: memref<1x32xf32, #tpu.memory_space<vmem>>, %arg3: memref<1x32xf32, #tpu.memory_space<vmem>>, %arg4: memref<32x128xbf16, #tpu.memory_space<vmem>>, %arg5: memref<1x128xf32, #tpu.memory_space<vmem>>, %arg6: memref<128x32xbf16, #tpu.memory_space<vmem>>, %arg7: memref<1x32xf32, #tpu.memory_space<vmem>>, %arg8: memref<16x32xf32, #tpu.memory_space<vmem>>) attributes {dimension_semantics = [#tpu.dimension_semantics<parallel>], iteration_bounds = array<i64: 1>, scalar_prefetch = 0 : i64, scratch_operands = 0 : i64, tpu.core_type = #tpu.core_type<tc>, window_params = [{transform_indices = @transform_0, window_bounds = array<i64: 16, 32>}, {pipeline_mode = #tpu.pipeline_mode<synchronous>, transform_indices = @transform_1, window_bounds = array<i64: 1, 32>}, {pipeline_mode = #tpu.pipeline_mode<synchronous>, transform_indices = @transform_2, window_bounds = array<i64: 1, 32>}, {pipeline_mode = #tpu.pipeline_mode<synchronous>, transform_indices = @transform_3, window_bounds = array<i64: 32, 128>}, {pipeline_mode = #tpu.pipeline_mode<synchronous>, transform_indices = @transform_4, window_bounds = array<i64: 1, 128>}, {pipeline_mode = #tpu.pipeline_mode<synchronous>, transform_indices = @transform_5, window_bounds = array<i64: 128, 32>}, {pipeline_mode = #tpu.pipeline_mode<synchronous>, transform_indices = @transform_6, window_bounds = array<i64: 1, 32>}, {transform_indices = @transform_7, window_bounds = array<i64: 16, 32>}]} {
    %c0 = arith.constant 0 : index
    %c0_0 = arith.constant 0 : index
    %0 = vector.load %arg1[%c0, %c0_0] : memref<16x32xf32, #tpu.memory_space<vmem>>, vector<16x32xf32>
    %c0_1 = arith.constant 0 : index
    %c0_2 = arith.constant 0 : index
    %1 = vector.load %arg2[%c0_1, %c0_2] : memref<1x32xf32, #tpu.memory_space<vmem>>, vector<1x32xf32>
    %c0_3 = arith.constant 0 : index
    %c0_4 = arith.constant 0 : index
    %2 = vector.load %arg3[%c0_3, %c0_4] : memref<1x32xf32, #tpu.memory_space<vmem>>, vector<1x32xf32>
    %cst = arith.constant dense<0.000000e+00> : vector<16xf32>
    %3 = vector.multi_reduction <add>, %0, %cst [1] : vector<16x32xf32> to vector<16xf32>
    %4 = vector.shape_cast %3 : vector<16xf32> to vector<16x1xf32>
    %cst_5 = arith.constant 3.200000e+01 : f32
    %5 = vector.broadcast %cst_5 : f32 to vector<16x1xf32>
    %6 = arith.divf %4, %5 : vector<16x1xf32>
    %7 = vector.broadcast %6 : vector<16x1xf32> to vector<16x32xf32>
    %8 = arith.subf %0, %7 : vector<16x32xf32>
    %9 = arith.mulf %8, %8 : vector<16x32xf32>
    %cst_6 = arith.constant dense<0.000000e+00> : vector<16xf32>
    %10 = vector.multi_reduction <add>, %9, %cst_6 [1] : vector<16x32xf32> to vector<16xf32>
    %11 = vector.shape_cast %10 : vector<16xf32> to vector<16x1xf32>
    %cst_7 = arith.constant 3.200000e+01 : f32
    %12 = vector.broadcast %cst_7 : f32 to vector<16x1xf32>
    %13 = arith.divf %11, %12 : vector<16x1xf32>
    %cst_8 = arith.constant 9.99999974E-6 : f32
    %14 = vector.broadcast %cst_8 : f32 to vector<16x1xf32>
    %15 = arith.addf %13, %14 : vector<16x1xf32>
    %16 = math.rsqrt %15 : vector<16x1xf32>
    %17 = vector.broadcast %16 : vector<16x1xf32> to vector<16x32xf32>
    %18 = arith.mulf %8, %17 : vector<16x32xf32>
    %19 = vector.broadcast %1 : vector<1x32xf32> to vector<16x32xf32>
    %20 = arith.mulf %18, %19 : vector<16x32xf32>
    %21 = vector.broadcast %2 : vector<1x32xf32> to vector<16x32xf32>
    %22 = arith.addf %20, %21 : vector<16x32xf32>
    %23 = arith.truncf %22 : vector<16x32xf32> to vector<16x32xbf16>
    %c0_9 = arith.constant 0 : index
    %c0_10 = arith.constant 0 : index
    %24 = vector.load %arg4[%c0_9, %c0_10] : memref<32x128xbf16, #tpu.memory_space<vmem>>, vector<32x128xbf16>
    %cst_11 = arith.constant dense<0.000000e+00> : vector<16x128xf32>
    %25 = tpu.matmul %23, %24, %cst_11 {dimension_numbers = #tpu.dot_dimension_numbers<[1], [0], [0], [1], [0, 0, 1, 1], [], []>} : vector<16x32xbf16>, vector<32x128xbf16>, vector<16x128xf32> -> vector<16x128xf32>
    %c0_12 = arith.constant 0 : index
    %c0_13 = arith.constant 0 : index
    %26 = vector.load %arg5[%c0_12, %c0_13] : memref<1x128xf32, #tpu.memory_space<vmem>>, vector<1x128xf32>
    %27 = vector.broadcast %26 : vector<1x128xf32> to vector<16x128xf32>
    %28 = arith.addf %25, %27 : vector<16x128xf32>
    %29 = arith.mulf %28, %28 : vector<16x128xf32>
    %30 = arith.mulf %28, %29 : vector<16x128xf32>
    %cst_14 = arith.constant 4.471500e-02 : f32
    %31 = vector.broadcast %cst_14 : f32 to vector<16x128xf32>
    %32 = arith.mulf %31, %30 : vector<16x128xf32>
    %33 = arith.addf %28, %32 : vector<16x128xf32>
    %cst_15 = arith.constant 0.797884583 : f32
    %34 = vector.broadcast %cst_15 : f32 to vector<16x128xf32>
    %35 = arith.mulf %34, %33 : vector<16x128xf32>
    %36 = math.tanh %35 : vector<16x128xf32>
    %cst_16 = arith.constant 1.000000e+00 : f32
    %37 = vector.broadcast %cst_16 : f32 to vector<16x128xf32>
    %38 = arith.addf %37, %36 : vector<16x128xf32>
    %cst_17 = arith.constant 5.000000e-01 : f32
    %39 = vector.broadcast %cst_17 : f32 to vector<16x128xf32>
    %40 = arith.mulf %39, %38 : vector<16x128xf32>
    %41 = arith.mulf %28, %40 : vector<16x128xf32>
    %42 = arith.truncf %41 : vector<16x128xf32> to vector<16x128xbf16>
    %c0_18 = arith.constant 0 : index
    %c0_19 = arith.constant 0 : index
    %43 = vector.load %arg6[%c0_18, %c0_19] : memref<128x32xbf16, #tpu.memory_space<vmem>>, vector<128x32xbf16>
    %cst_20 = arith.constant dense<0.000000e+00> : vector<16x32xf32>
    %44 = tpu.matmul %42, %43, %cst_20 {dimension_numbers = #tpu.dot_dimension_numbers<[1], [0], [0], [1], [0, 0, 1, 1], [], []>} : vector<16x128xbf16>, vector<128x32xbf16>, vector<16x32xf32> -> vector<16x32xf32>
    %c0_21 = arith.constant 0 : index
    %c0_22 = arith.constant 0 : index
    %45 = vector.load %arg7[%c0_21, %c0_22] : memref<1x32xf32, #tpu.memory_space<vmem>>, vector<1x32xf32>
    %46 = vector.broadcast %45 : vector<1x32xf32> to vector<16x32xf32>
    %47 = arith.addf %44, %46 : vector<16x32xf32>
    %48 = arith.addf %0, %47 : vector<16x32xf32>
    %c0_23 = arith.constant 0 : index
    %c0_24 = arith.constant 0 : index
    %49 = vector.load %arg8[%c0_23, %c0_24] : memref<16x32xf32, #tpu.memory_space<vmem>>, vector<16x32xf32>
    tpu.vector_store %arg8[%c0_23, %c0_24], %48 {strides = array<i32>} : memref<16x32xf32, #tpu.memory_space<vmem>>, vector<16x32xf32>,
    return
  }
  func.func @transform_0(%arg0: i32) -> (i32, i32) {
    %c0_i32 = arith.constant 0 : i32
    %c0_i32_0 = arith.constant 0 : i32
    return %arg0, %c0_i32 : i32, i32
  }
  func.func @transform_1(%arg0: i32) -> (i32, i32) {
    %c0_i32 = arith.constant 0 : i32
    %c0_i32_0 = arith.constant 0 : i32
    %c0_i32_1 = arith.constant 0 : i32
    return %c0_i32, %c0_i32_0 : i32, i32
  }
  func.func @transform_2(%arg0: i32) -> (i32, i32) {
    %c0_i32 = arith.constant 0 : i32
    %c0_i32_0 = arith.constant 0 : i32
    %c0_i32_1 = arith.constant 0 : i32
    return %c0_i32, %c0_i32_0 : i32, i32
  }
  func.func @transform_3(%arg0: i32) -> (i32, i32) {
    %c0_i32 = arith.constant 0 : i32
    %c0_i32_0 = arith.constant 0 : i32
    %c0_i32_1 = arith.constant 0 : i32
    return %c0_i32, %c0_i32_0 : i32, i32
  }
  func.func @transform_4(%arg0: i32) -> (i32, i32) {
    %c0_i32 = arith.constant 0 : i32
    %c0_i32_0 = arith.constant 0 : i32
    %c0_i32_1 = arith.constant 0 : i32
    return %c0_i32, %c0_i32_0 : i32, i32
  }
  func.func @transform_5(%arg0: i32) -> (i32, i32) {
    %c0_i32 = arith.constant 0 : i32
    %c0_i32_0 = arith.constant 0 : i32
    %c0_i32_1 = arith.constant 0 : i32
    return %c0_i32, %c0_i32_0 : i32, i32
  }
  func.func @transform_6(%arg0: i32) -> (i32, i32) {
    %c0_i32 = arith.constant 0 : i32
    %c0_i32_0 = arith.constant 0 : i32
    %c0_i32_1 = arith.constant 0 : i32
    return %c0_i32, %c0_i32_0 : i32, i32
  }
  func.func @transform_7(%arg0: i32) -> (i32, i32) {
    %c0_i32 = arith.constant 0 : i32
    %c0_i32_0 = arith.constant 0 : i32
    return %arg0, %c0_i32 : i32, i32
  }
}

module attributes {stable_mosaic.version = 11 : i64} {
  func.func @_attn_block_kernel(%arg0: i32, %arg1: i32, %arg2: memref<1x8x32xf32, #tpu.memory_space<vmem>>, %arg3: memref<1x32xf32, #tpu.memory_space<vmem>>, %arg4: memref<1x32xf32, #tpu.memory_space<vmem>>, %arg5: memref<32x96xbf16, #tpu.memory_space<vmem>>, %arg6: memref<1x96xf32, #tpu.memory_space<vmem>>, %arg7: memref<32x32xbf16, #tpu.memory_space<vmem>>, %arg8: memref<1x32xf32, #tpu.memory_space<vmem>>, %arg9: memref<1x8x32xf32, #tpu.memory_space<vmem>>, %arg10: memref<4x8x8xbf16, #tpu.memory_space<vmem>>, %arg11: memref<4x8x8xbf16, #tpu.memory_space<vmem>>, %arg12: memref<4x8x8xbf16, #tpu.memory_space<vmem>>, %arg13: memref<4x8x8xbf16, #tpu.memory_space<vmem>>, %arg14: memref<8x8xf32, #tpu.memory_space<vmem>>) attributes {dimension_semantics = [#tpu.dimension_semantics<parallel>, #tpu.dimension_semantics<arbitrary>], iteration_bounds = array<i64: 2, 4>, scalar_prefetch = 0 : i64, scratch_operands = 5 : i64, tpu.core_type = #tpu.core_type<tc>, window_params = [{transform_indices = @transform_0, window_bounds = array<i64: 1, 8, 32>}, {pipeline_mode = #tpu.pipeline_mode<synchronous>, transform_indices = @transform_1, window_bounds = array<i64: 1, 32>}, {pipeline_mode = #tpu.pipeline_mode<synchronous>, transform_indices = @transform_2, window_bounds = array<i64: 1, 32>}, {pipeline_mode = #tpu.pipeline_mode<synchronous>, transform_indices = @transform_3, window_bounds = array<i64: 32, 96>}, {pipeline_mode = #tpu.pipeline_mode<synchronous>, transform_indices = @transform_4, window_bounds = array<i64: 1, 96>}, {pipeline_mode = #tpu.pipeline_mode<synchronous>, transform_indices = @transform_5, window_bounds = array<i64: 32, 32>}, {pipeline_mode = #tpu.pipeline_mode<synchronous>, transform_indices = @transform_6, window_bounds = array<i64: 1, 32>}, {transform_indices = @transform_7, window_bounds = array<i64: 1, 8, 32>}]} {
    %c0_i32 = arith.constant 0 : i32
    %0 = arith.cmpi eq, %arg1, %c0_i32 : i32
    %1 = arith.extui %0 : i1 to i32
    %c0_i32_0 = arith.constant 0 : i32
    %2 = arith.cmpi ne, %1, %c0_i32_0 : i32
    scf.if %2 {
      %35 = tpu.iota {dimensions = array<i32: 0>} : vector<8x8xi32>
      %36 = tpu.iota {dimensions = array<i32: 1>} : vector<8x8xi32>
      %37 = arith.cmpi sle, %36, %35 : vector<8x8xi32>
      %cst_14 = arith.constant 0.000000e+00 : f32
      %cst_15 = arith.constant -1.000000e+30 : f32
      %38 = vector.broadcast %cst_14 : f32 to vector<8x8xf32>
      %39 = vector.broadcast %cst_15 : f32 to vector<8x8xf32>
      %40 = arith.select %37, %38, %39 : vector<8x8xi1>, vector<8x8xf32>
      %c0_16 = arith.constant 0 : index
      %c0_17 = arith.constant 0 : index
      %41 = vector.load %arg14[%c0_16, %c0_17] : memref<8x8xf32, #tpu.memory_space<vmem>>, vector<8x8xf32>
      tpu.vector_store %arg14[%c0_16, %c0_17], %40 {strides = array<i32>} : memref<8x8xf32, #tpu.memory_space<vmem>>, vector<8x8xf32>,
      %c0_18 = arith.constant 0 : index
      %c0_19 = arith.constant 0 : index
      %c0_20 = arith.constant 0 : index
      %42 = vector.load %arg2[%c0_18, %c0_19, %c0_20] : memref<1x8x32xf32, #tpu.memory_space<vmem>>, vector<1x8x32xf32>
      %43 = vector.shape_cast %42 : vector<1x8x32xf32> to vector<8x32xf32>
      %c0_21 = arith.constant 0 : index
      %c0_22 = arith.constant 0 : index
      %44 = vector.load %arg3[%c0_21, %c0_22] : memref<1x32xf32, #tpu.memory_space<vmem>>, vector<1x32xf32>
      %c0_23 = arith.constant 0 : index
      %c0_24 = arith.constant 0 : index
      %45 = vector.load %arg4[%c0_23, %c0_24] : memref<1x32xf32, #tpu.memory_space<vmem>>, vector<1x32xf32>
      %cst_25 = arith.constant dense<0.000000e+00> : vector<8xf32>
      %46 = vector.multi_reduction <add>, %43, %cst_25 [1] : vector<8x32xf32> to vector<8xf32>
      %47 = vector.shape_cast %46 : vector<8xf32> to vector<8x1xf32>
      %cst_26 = arith.constant 3.200000e+01 : f32
      %48 = vector.broadcast %cst_26 : f32 to vector<8x1xf32>
      %49 = arith.divf %47, %48 : vector<8x1xf32>
      %50 = vector.broadcast %49 : vector<8x1xf32> to vector<8x32xf32>
      %51 = arith.subf %43, %50 : vector<8x32xf32>
      %52 = arith.mulf %51, %51 : vector<8x32xf32>
      %cst_27 = arith.constant dense<0.000000e+00> : vector<8xf32>
      %53 = vector.multi_reduction <add>, %52, %cst_27 [1] : vector<8x32xf32> to vector<8xf32>
      %54 = vector.shape_cast %53 : vector<8xf32> to vector<8x1xf32>
      %cst_28 = arith.constant 3.200000e+01 : f32
      %55 = vector.broadcast %cst_28 : f32 to vector<8x1xf32>
      %56 = arith.divf %54, %55 : vector<8x1xf32>
      %cst_29 = arith.constant 9.99999974E-6 : f32
      %57 = vector.broadcast %cst_29 : f32 to vector<8x1xf32>
      %58 = arith.addf %56, %57 : vector<8x1xf32>
      %59 = math.rsqrt %58 : vector<8x1xf32>
      %60 = vector.broadcast %59 : vector<8x1xf32> to vector<8x32xf32>
      %61 = arith.mulf %51, %60 : vector<8x32xf32>
      %62 = vector.broadcast %44 : vector<1x32xf32> to vector<8x32xf32>
      %63 = arith.mulf %61, %62 : vector<8x32xf32>
      %64 = vector.broadcast %45 : vector<1x32xf32> to vector<8x32xf32>
      %65 = arith.addf %63, %64 : vector<8x32xf32>
      %66 = arith.truncf %65 : vector<8x32xf32> to vector<8x32xbf16>
      %c0_30 = arith.constant 0 : index
      %c0_31 = arith.constant 0 : index
      %67 = vector.load %arg5[%c0_30, %c0_31] : memref<32x96xbf16, #tpu.memory_space<vmem>>, vector<32x96xbf16>
      %cst_32 = arith.constant dense<0.000000e+00> : vector<8x96xf32>
      %68 = tpu.matmul %66, %67, %cst_32 {dimension_numbers = #tpu.dot_dimension_numbers<[1], [0], [0], [1], [0, 0, 1, 1], [], []>} : vector<8x32xbf16>, vector<32x96xbf16>, vector<8x96xf32> -> vector<8x96xf32>
      %c0_33 = arith.constant 0 : index
      %c0_34 = arith.constant 0 : index
      %69 = vector.load %arg6[%c0_33, %c0_34] : memref<1x96xf32, #tpu.memory_space<vmem>>, vector<1x96xf32>
      %70 = vector.broadcast %69 : vector<1x96xf32> to vector<8x96xf32>
      %71 = arith.addf %68, %70 : vector<8x96xf32>
      %72 = arith.truncf %71 : vector<8x96xf32> to vector<8x96xbf16>
      %73 = vector.extract_strided_slice %72 {offsets = [0, 0], sizes = [8, 8], strides = [1, 1]} : vector<8x96xbf16> to vector<8x8xbf16>
      %c0_35 = arith.constant 0 : index
      %c0_36 = arith.constant 0 : index
      %c0_37 = arith.constant 0 : index
      %74 = vector.load %arg10[%c0_35, %c0_36, %c0_37] : memref<4x8x8xbf16, #tpu.memory_space<vmem>>, vector<1x8x8xbf16>
      %75 = vector.shape_cast %74 : vector<1x8x8xbf16> to vector<8x8xbf16>
      %76 = vector.shape_cast %73 : vector<8x8xbf16> to vector<1x8x8xbf16>
      tpu.vector_store %arg10[%c0_35, %c0_36, %c0_37], %76 {strides = array<i32>} : memref<4x8x8xbf16, #tpu.memory_space<vmem>>, vector<1x8x8xbf16>,
      %77 = vector.extract_strided_slice %72 {offsets = [0, 32], sizes = [8, 8], strides = [1, 1]} : vector<8x96xbf16> to vector<8x8xbf16>
      %c0_38 = arith.constant 0 : index
      %c0_39 = arith.constant 0 : index
      %c0_40 = arith.constant 0 : index
      %78 = vector.load %arg11[%c0_38, %c0_39, %c0_40] : memref<4x8x8xbf16, #tpu.memory_space<vmem>>, vector<1x8x8xbf16>
      %79 = vector.shape_cast %78 : vector<1x8x8xbf16> to vector<8x8xbf16>
      %80 = vector.shape_cast %77 : vector<8x8xbf16> to vector<1x8x8xbf16>
      tpu.vector_store %arg11[%c0_38, %c0_39, %c0_40], %80 {strides = array<i32>} : memref<4x8x8xbf16, #tpu.memory_space<vmem>>, vector<1x8x8xbf16>,
      %81 = vector.extract_strided_slice %72 {offsets = [0, 64], sizes = [8, 8], strides = [1, 1]} : vector<8x96xbf16> to vector<8x8xbf16>
      %c0_41 = arith.constant 0 : index
      %c0_42 = arith.constant 0 : index
      %c0_43 = arith.constant 0 : index
      %82 = vector.load %arg12[%c0_41, %c0_42, %c0_43] : memref<4x8x8xbf16, #tpu.memory_space<vmem>>, vector<1x8x8xbf16>
      %83 = vector.shape_cast %82 : vector<1x8x8xbf16> to vector<8x8xbf16>
      %84 = vector.shape_cast %81 : vector<8x8xbf16> to vector<1x8x8xbf16>
      tpu.vector_store %arg12[%c0_41, %c0_42, %c0_43], %84 {strides = array<i32>} : memref<4x8x8xbf16, #tpu.memory_space<vmem>>, vector<1x8x8xbf16>,
      %85 = vector.extract_strided_slice %72 {offsets = [0, 8], sizes = [8, 8], strides = [1, 1]} : vector<8x96xbf16> to vector<8x8xbf16>
      %c1 = arith.constant 1 : index
      %c0_44 = arith.constant 0 : index
      %c0_45 = arith.constant 0 : index
      %86 = vector.load %arg10[%c1, %c0_44, %c0_45] : memref<4x8x8xbf16, #tpu.memory_space<vmem>>, vector<1x8x8xbf16>
      %87 = vector.shape_cast %86 : vector<1x8x8xbf16> to vector<8x8xbf16>
      %88 = vector.shape_cast %85 : vector<8x8xbf16> to vector<1x8x8xbf16>
      tpu.vector_store %arg10[%c1, %c0_44, %c0_45], %88 {strides = array<i32>} : memref<4x8x8xbf16, #tpu.memory_space<vmem>>, vector<1x8x8xbf16>,
      %89 = vector.extract_strided_slice %72 {offsets = [0, 40], sizes = [8, 8], strides = [1, 1]} : vector<8x96xbf16> to vector<8x8xbf16>
      %c1_46 = arith.constant 1 : index
      %c0_47 = arith.constant 0 : index
      %c0_48 = arith.constant 0 : index
      %90 = vector.load %arg11[%c1_46, %c0_47, %c0_48] : memref<4x8x8xbf16, #tpu.memory_space<vmem>>, vector<1x8x8xbf16>
      %91 = vector.shape_cast %90 : vector<1x8x8xbf16> to vector<8x8xbf16>
      %92 = vector.shape_cast %89 : vector<8x8xbf16> to vector<1x8x8xbf16>
      tpu.vector_store %arg11[%c1_46, %c0_47, %c0_48], %92 {strides = array<i32>} : memref<4x8x8xbf16, #tpu.memory_space<vmem>>, vector<1x8x8xbf16>,
      %93 = vector.extract_strided_slice %72 {offsets = [0, 72], sizes = [8, 8], strides = [1, 1]} : vector<8x96xbf16> to vector<8x8xbf16>
      %c1_49 = arith.constant 1 : index
      %c0_50 = arith.constant 0 : index
      %c0_51 = arith.constant 0 : index
      %94 = vector.load %arg12[%c1_49, %c0_50, %c0_51] : memref<4x8x8xbf16, #tpu.memory_space<vmem>>, vector<1x8x8xbf16>
      %95 = vector.shape_cast %94 : vector<1x8x8xbf16> to vector<8x8xbf16>
      %96 = vector.shape_cast %93 : vector<8x8xbf16> to vector<1x8x8xbf16>
      tpu.vector_store %arg12[%c1_49, %c0_50, %c0_51], %96 {strides = array<i32>} : memref<4x8x8xbf16, #tpu.memory_space<vmem>>, vector<1x8x8xbf16>,
      %97 = vector.extract_strided_slice %72 {offsets = [0, 16], sizes = [8, 8], strides = [1, 1]} : vector<8x96xbf16> to vector<8x8xbf16>
      %c2 = arith.constant 2 : index
      %c0_52 = arith.constant 0 : index
      %c0_53 = arith.constant 0 : index
      %98 = vector.load %arg10[%c2, %c0_52, %c0_53] : memref<4x8x8xbf16, #tpu.memory_space<vmem>>, vector<1x8x8xbf16>
      %99 = vector.shape_cast %98 : vector<1x8x8xbf16> to vector<8x8xbf16>
      %100 = vector.shape_cast %97 : vector<8x8xbf16> to vector<1x8x8xbf16>
      tpu.vector_store %arg10[%c2, %c0_52, %c0_53], %100 {strides = array<i32>} : memref<4x8x8xbf16, #tpu.memory_space<vmem>>, vector<1x8x8xbf16>,
      %101 = vector.extract_strided_slice %72 {offsets = [0, 48], sizes = [8, 8], strides = [1, 1]} : vector<8x96xbf16> to vector<8x8xbf16>
      %c2_54 = arith.constant 2 : index
      %c0_55 = arith.constant 0 : index
      %c0_56 = arith.constant 0 : index
      %102 = vector.load %arg11[%c2_54, %c0_55, %c0_56] : memref<4x8x8xbf16, #tpu.memory_space<vmem>>, vector<1x8x8xbf16>
      %103 = vector.shape_cast %102 : vector<1x8x8xbf16> to vector<8x8xbf16>
      %104 = vector.shape_cast %101 : vector<8x8xbf16> to vector<1x8x8xbf16>
      tpu.vector_store %arg11[%c2_54, %c0_55, %c0_56], %104 {strides = array<i32>} : memref<4x8x8xbf16, #tpu.memory_space<vmem>>, vector<1x8x8xbf16>,
      %105 = vector.extract_strided_slice %72 {offsets = [0, 80], sizes = [8, 8], strides = [1, 1]} : vector<8x96xbf16> to vector<8x8xbf16>
      %c2_57 = arith.constant 2 : index
      %c0_58 = arith.constant 0 : index
      %c0_59 = arith.constant 0 : index
      %106 = vector.load %arg12[%c2_57, %c0_58, %c0_59] : memref<4x8x8xbf16, #tpu.memory_space<vmem>>, vector<1x8x8xbf16>
      %107 = vector.shape_cast %106 : vector<1x8x8xbf16> to vector<8x8xbf16>
      %108 = vector.shape_cast %105 : vector<8x8xbf16> to vector<1x8x8xbf16>
      tpu.vector_store %arg12[%c2_57, %c0_58, %c0_59], %108 {strides = array<i32>} : memref<4x8x8xbf16, #tpu.memory_space<vmem>>, vector<1x8x8xbf16>,
      %109 = vector.extract_strided_slice %72 {offsets = [0, 24], sizes = [8, 8], strides = [1, 1]} : vector<8x96xbf16> to vector<8x8xbf16>
      %c3 = arith.constant 3 : index
      %c0_60 = arith.constant 0 : index
      %c0_61 = arith.constant 0 : index
      %110 = vector.load %arg10[%c3, %c0_60, %c0_61] : memref<4x8x8xbf16, #tpu.memory_space<vmem>>, vector<1x8x8xbf16>
      %111 = vector.shape_cast %110 : vector<1x8x8xbf16> to vector<8x8xbf16>
      %112 = vector.shape_cast %109 : vector<8x8xbf16> to vector<1x8x8xbf16>
      tpu.vector_store %arg10[%c3, %c0_60, %c0_61], %112 {strides = array<i32>} : memref<4x8x8xbf16, #tpu.memory_space<vmem>>, vector<1x8x8xbf16>,
      %113 = vector.extract_strided_slice %72 {offsets = [0, 56], sizes = [8, 8], strides = [1, 1]} : vector<8x96xbf16> to vector<8x8xbf16>
      %c3_62 = arith.constant 3 : index
      %c0_63 = arith.constant 0 : index
      %c0_64 = arith.constant 0 : index
      %114 = vector.load %arg11[%c3_62, %c0_63, %c0_64] : memref<4x8x8xbf16, #tpu.memory_space<vmem>>, vector<1x8x8xbf16>
      %115 = vector.shape_cast %114 : vector<1x8x8xbf16> to vector<8x8xbf16>
      %116 = vector.shape_cast %113 : vector<8x8xbf16> to vector<1x8x8xbf16>
      tpu.vector_store %arg11[%c3_62, %c0_63, %c0_64], %116 {strides = array<i32>} : memref<4x8x8xbf16, #tpu.memory_space<vmem>>, vector<1x8x8xbf16>,
      %117 = vector.extract_strided_slice %72 {offsets = [0, 88], sizes = [8, 8], strides = [1, 1]} : vector<8x96xbf16> to vector<8x8xbf16>
      %c3_65 = arith.constant 3 : index
      %c0_66 = arith.constant 0 : index
      %c0_67 = arith.constant 0 : index
      %118 = vector.load %arg12[%c3_65, %c0_66, %c0_67] : memref<4x8x8xbf16, #tpu.memory_space<vmem>>, vector<1x8x8xbf16>
      %119 = vector.shape_cast %118 : vector<1x8x8xbf16> to vector<8x8xbf16>
      %120 = vector.shape_cast %117 : vector<8x8xbf16> to vector<1x8x8xbf16>
      tpu.vector_store %arg12[%c3_65, %c0_66, %c0_67], %120 {strides = array<i32>} : memref<4x8x8xbf16, #tpu.memory_space<vmem>>, vector<1x8x8xbf16>,
    } else {
    }
    %3 = arith.index_cast %arg1 : i32 to index
    %c0 = arith.constant 0 : index
    %c0_1 = arith.constant 0 : index
    %4 = vector.load %arg10[%3, %c0, %c0_1] : memref<4x8x8xbf16, #tpu.memory_space<vmem>>, vector<1x8x8xbf16>
    %5 = vector.shape_cast %4 : vector<1x8x8xbf16> to vector<8x8xbf16>
    %6 = arith.index_cast %arg1 : i32 to index
    %c0_2 = arith.constant 0 : index
    %c0_3 = arith.constant 0 : index
    %7 = vector.load %arg11[%6, %c0_2, %c0_3] : memref<4x8x8xbf16, #tpu.memory_space<vmem>>, vector<1x8x8xbf16>
    %8 = vector.shape_cast %7 : vector<1x8x8xbf16> to vector<8x8xbf16>
    %9 = arith.index_cast %arg1 : i32 to index
    %c0_4 = arith.constant 0 : index
    %c0_5 = arith.constant 0 : index
    %10 = vector.load %arg12[%9, %c0_4, %c0_5] : memref<4x8x8xbf16, #tpu.memory_space<vmem>>, vector<1x8x8xbf16>
    %11 = vector.shape_cast %10 : vector<1x8x8xbf16> to vector<8x8xbf16>
    %cst = arith.constant dense<0.000000e+00> : vector<8x8xf32>
    %12 = tpu.matmul %5, %8, %cst {dimension_numbers = #tpu.dot_dimension_numbers<[1], [1], [0], [0], [0, 0, 1, 0], [], []>} : vector<8x8xbf16>, vector<8x8xbf16>, vector<8x8xf32> -> vector<8x8xf32>
    %c0_6 = arith.constant 0 : index
    %c0_7 = arith.constant 0 : index
    %13 = vector.load %arg14[%c0_6, %c0_7] : memref<8x8xf32, #tpu.memory_space<vmem>>, vector<8x8xf32>
    %14 = arith.addf %12, %13 : vector<8x8xf32>
    %cst_8 = arith.constant dense<0xFF800000> : vector<8xf32>
    %15 = vector.multi_reduction <maximumf>, %14, %cst_8 [1] : vector<8x8xf32> to vector<8xf32>
    %16 = vector.shape_cast %15 : vector<8xf32> to vector<8x1xf32>
    %17 = vector.broadcast %16 : vector<8x1xf32> to vector<8x8xf32>
    %18 = arith.subf %14, %17 : vector<8x8xf32>
    %19 = math.exp %18 : vector<8x8xf32>
    %cst_9 = arith.constant dense<0.000000e+00> : vector<8xf32>
    %20 = vector.multi_reduction <add>, %19, %cst_9 [1] : vector<8x8xf32> to vector<8xf32>
    %21 = vector.shape_cast %20 : vector<8xf32> to vector<8x1xf32>
    %22 = arith.truncf %19 : vector<8x8xf32> to vector<8x8xbf16>
    %cst_10 = arith.constant dense<0.000000e+00> : vector<8x8xf32>
    %23 = tpu.matmul %22, %11, %cst_10 {dimension_numbers = #tpu.dot_dimension_numbers<[1], [0], [0], [1], [0, 0, 1, 1], [], []>} : vector<8x8xbf16>, vector<8x8xbf16>, vector<8x8xf32> -> vector<8x8xf32>
    %24 = tpu.reciprocal %21 {approx = true} : vector<8x1xf32> -> vector<8x1xf32>
    %25 = vector.broadcast %24 : vector<8x1xf32> to vector<8x8xf32>
    %26 = arith.mulf %23, %25 : vector<8x8xf32>
    %27 = arith.truncf %26 : vector<8x8xf32> to vector<8x8xbf16>
    %28 = arith.index_cast %arg1 : i32 to index
    %c0_11 = arith.constant 0 : index
    %c0_12 = arith.constant 0 : index
    %29 = vector.load %arg13[%28, %c0_11, %c0_12] : memref<4x8x8xbf16, #tpu.memory_space<vmem>>, vector<1x8x8xbf16>
    %30 = vector.shape_cast %29 : vector<1x8x8xbf16> to vector<8x8xbf16>
    %31 = vector.shape_cast %27 : vector<8x8xbf16> to vector<1x8x8xbf16>
    tpu.vector_store %arg13[%28, %c0_11, %c0_12], %31 {strides = array<i32>} : memref<4x8x8xbf16, #tpu.memory_space<vmem>>, vector<1x8x8xbf16>,
    %c3_i32 = arith.constant 3 : i32
    %32 = arith.cmpi eq, %arg1, %c3_i32 : i32
    %33 = arith.extui %32 : i1 to i32
    %c0_i32_13 = arith.constant 0 : i32
    %34 = arith.cmpi ne, %33, %c0_i32_13 : i32
    scf.if %34 {
      %c0_14 = arith.constant 0 : index
      %c0_15 = arith.constant 0 : index
      %c0_16 = arith.constant 0 : index
      %35 = vector.load %arg13[%c0_14, %c0_15, %c0_16] : memref<4x8x8xbf16, #tpu.memory_space<vmem>>, vector<1x8x8xbf16>
      %36 = vector.shape_cast %35 : vector<1x8x8xbf16> to vector<8x8xbf16>
      %c1 = arith.constant 1 : index
      %c0_17 = arith.constant 0 : index
      %c0_18 = arith.constant 0 : index
      %37 = vector.load %arg13[%c1, %c0_17, %c0_18] : memref<4x8x8xbf16, #tpu.memory_space<vmem>>, vector<1x8x8xbf16>
      %38 = vector.shape_cast %37 : vector<1x8x8xbf16> to vector<8x8xbf16>
      %c2 = arith.constant 2 : index
      %c0_19 = arith.constant 0 : index
      %c0_20 = arith.constant 0 : index
      %39 = vector.load %arg13[%c2, %c0_19, %c0_20] : memref<4x8x8xbf16, #tpu.memory_space<vmem>>, vector<1x8x8xbf16>
      %40 = vector.shape_cast %39 : vector<1x8x8xbf16> to vector<8x8xbf16>
      %c3 = arith.constant 3 : index
      %c0_21 = arith.constant 0 : index
      %c0_22 = arith.constant 0 : index
      %41 = vector.load %arg13[%c3, %c0_21, %c0_22] : memref<4x8x8xbf16, #tpu.memory_space<vmem>>, vector<1x8x8xbf16>
      %42 = vector.shape_cast %41 : vector<1x8x8xbf16> to vector<8x8xbf16>
      %43 = tpu.concatenate %36, %38, %40, %42 in 1 : vector<8x8xbf16>, vector<8x8xbf16>, vector<8x8xbf16>, vector<8x8xbf16> -> vector<8x32xbf16>
      %c0_23 = arith.constant 0 : index
      %c0_24 = arith.constant 0 : index
      %44 = vector.load %arg7[%c0_23, %c0_24] : memref<32x32xbf16, #tpu.memory_space<vmem>>, vector<32x32xbf16>
      %cst_25 = arith.constant dense<0.000000e+00> : vector<8x32xf32>
      %45 = tpu.matmul %43, %44, %cst_25 {dimension_numbers = #tpu.dot_dimension_numbers<[1], [0], [0], [1], [0, 0, 1, 1], [], []>} : vector<8x32xbf16>, vector<32x32xbf16>, vector<8x32xf32> -> vector<8x32xf32>
      %c0_26 = arith.constant 0 : index
      %c0_27 = arith.constant 0 : index
      %46 = vector.load %arg8[%c0_26, %c0_27] : memref<1x32xf32, #tpu.memory_space<vmem>>, vector<1x32xf32>
      %47 = vector.broadcast %46 : vector<1x32xf32> to vector<8x32xf32>
      %48 = arith.addf %45, %47 : vector<8x32xf32>
      %c0_28 = arith.constant 0 : index
      %c0_29 = arith.constant 0 : index
      %c0_30 = arith.constant 0 : index
      %49 = vector.load %arg2[%c0_28, %c0_29, %c0_30] : memref<1x8x32xf32, #tpu.memory_space<vmem>>, vector<1x8x32xf32>
      %50 = vector.shape_cast %49 : vector<1x8x32xf32> to vector<8x32xf32>
      %51 = arith.addf %50, %48 : vector<8x32xf32>
      %c0_31 = arith.constant 0 : index
      %c0_32 = arith.constant 0 : index
      %c0_33 = arith.constant 0 : index
      %52 = vector.load %arg9[%c0_31, %c0_32, %c0_33] : memref<1x8x32xf32, #tpu.memory_space<vmem>>, vector<1x8x32xf32>
      %53 = vector.shape_cast %52 : vector<1x8x32xf32> to vector<8x32xf32>
      %54 = vector.shape_cast %51 : vector<8x32xf32> to vector<1x8x32xf32>
      tpu.vector_store %arg9[%c0_31, %c0_32, %c0_33], %54 {strides = array<i32>} : memref<1x8x32xf32, #tpu.memory_space<vmem>>, vector<1x8x32xf32>,
    } else {
    }
    return
  }
  func.func @transform_0(%arg0: i32, %arg1: i32) -> (i32, i32, i32) {
    %c0_i32 = arith.constant 0 : i32
    %c0_i32_0 = arith.constant 0 : i32
    %c0_i32_1 = arith.constant 0 : i32
    return %arg0, %c0_i32, %c0_i32_0 : i32, i32, i32
  }
  func.func @transform_1(%arg0: i32, %arg1: i32) -> (i32, i32) {
    %c0_i32 = arith.constant 0 : i32
    %c0_i32_0 = arith.constant 0 : i32
    %c0_i32_1 = arith.constant 0 : i32
    return %c0_i32, %c0_i32_0 : i32, i32
  }
  func.func @transform_2(%arg0: i32, %arg1: i32) -> (i32, i32) {
    %c0_i32 = arith.constant 0 : i32
    %c0_i32_0 = arith.constant 0 : i32
    %c0_i32_1 = arith.constant 0 : i32
    return %c0_i32, %c0_i32_0 : i32, i32
  }
  func.func @transform_3(%arg0: i32, %arg1: i32) -> (i32, i32) {
    %c0_i32 = arith.constant 0 : i32
    %c0_i32_0 = arith.constant 0 : i32
    %c0_i32_1 = arith.constant 0 : i32
    return %c0_i32, %c0_i32_0 : i32, i32
  }
  func.func @transform_4(%arg0: i32, %arg1: i32) -> (i32, i32) {
    %c0_i32 = arith.constant 0 : i32
    %c0_i32_0 = arith.constant 0 : i32
    %c0_i32_1 = arith.constant 0 : i32
    return %c0_i32, %c0_i32_0 : i32, i32
  }
  func.func @transform_5(%arg0: i32, %arg1: i32) -> (i32, i32) {
    %c0_i32 = arith.constant 0 : i32
    %c0_i32_0 = arith.constant 0 : i32
    %c0_i32_1 = arith.constant 0 : i32
    return %c0_i32, %c0_i32_0 : i32, i32
  }
  func.func @transform_6(%arg0: i32, %arg1: i32) -> (i32, i32) {
    %c0_i32 = arith.constant 0 : i32
    %c0_i32_0 = arith.constant 0 : i32
    %c0_i32_1 = arith.constant 0 : i32
    return %c0_i32, %c0_i32_0 : i32, i32
  }
  func.func @transform_7(%arg0: i32, %arg1: i32) -> (i32, i32, i32) {
    %c0_i32 = arith.constant 0 : i32
    %c0_i32_0 = arith.constant 0 : i32
    %c0_i32_1 = arith.constant 0 : i32
    return %arg0, %c0_i32, %c0_i32_0 : i32, i32, i32
  }
}

</mosaic_0001>

<bundles_post_ra>
// kernel: gpt2_block_forward.3
= control target key start
LH: loop header
LB: loop body
LE: loop exit
PB: predicated region body
PF: predicated region fallthrough
CT: control target
= control target key end

     0   :  { %vm32_vm0 = vcmask 261120   ;;  %s462_s0 = inlined_call_operand.vmem [shape: f32[16,32], index: 0, kind: input, shape index: {}]   ;;  %s463_s1 = inlined_call_operand.vmem [shape: f32[1,32], index: 1, kind: input, shape index: {}]   ;;  %s464_s2 = inlined_call_operand.vmem [shape: f32[1,32], index: 2, kind: input, shape index: {}]   ;;  %s465_s3 = inlined_call_operand.vmem [shape: bf16[32,128], index: 3, kind: input, shape index: {}]   ;;  %s466_s4 = inlined_call_operand.vmem [shape: f32[1,128], index: 4, kind: input, shape index: {}]   ;;  %s467_s5 = inlined_call_operand.vmem [shape: bf16[128,32], index: 5, kind: input, shape index: {}]   ;;  %s468_s6 = inlined_call_operand.vmem [shape: f32[1,32], index: 6, kind: input, shape index: {}]   ;;  %s469_s7 = inlined_call_operand.hbm [shape: f32[16,32], index: 7, kind: output, shape index: {}]  }
   0x1   :  { %v397_v0 = vld [vmem:[%s462_s0] sm:$0xff] }
   0x2   :  { %v33_v1 = vsel %vm32_vm0, %v397_v0, 0.0 }
   0x3   :  { %34 = vadd.xlane.f32.xlu0 %v33_v1 }
   0x4   :  { %12 = vsyncpa [#allocation3], 0  ;;  %v404_v2 = vld [vmem:[%s462_s0 + $0x8] sm:$0xff]  ;;  %v350_v4 = vmov 32.0   ;;  %v296_v23 = vld [vmem:[%s465_s3] sm:$0xff]  ;;  %s351_s27 = smov [#allocation2]  }
   0x5   :  { %v36_v3 = vsel %vm32_vm0, %v404_v2, 0.0  ;;  %314 = vrcp.f32 %v350_v4  ;;  %v297_v21 = vld [vmem:[%s465_s3 + $0x8] sm:$0xff]  ;;  %v310_v42 = vld [vmem:[%s463_s1] ss:$0 sm:$0xff]  ;;  %v305_v52 = vld [vmem:[%s467_s5 + $0x38] sm:$0xff]  ;;  %s241_s0 = sshll.u32 %s351_s27, 4  ;;  %s242_s0 = int_to_ptr.vmem [resolvable:$true] %s241_s0 }
   0x6   :  { %124 = vmatpush.bf16.msra.mxu0 %v297_v21  ;;  %v311_v47 = vld [vmem:[%s464_s2] ss:$0 sm:$0xff]  ;;  %219 = vmatpush.bf16.msra.mxu1 %v305_v52  ;;  %v304_v53 = vld [vmem:[%s467_s5 + $0x30] sm:$0xff]  ;;  %v303_v54 = vld [vmem:[%s467_s5 + $0x28] sm:$0xff]  ;;  %s243_s30 = sshll.u32 %s469_s7, 4  ;;  %s353_s3 = smov 8   ;;  %s244_s30 = int_to_ptr.hbm [resolvable:$true] %s243_s30 }
   0x7   :  { %v302_v55 = vld [vmem:[%s467_s5 + $0x20] sm:$0xff]  ;;  %v301_v56 = vld [vmem:[%s467_s5 + $0x18] sm:$0xff]  ;;  %v300_v57 = vld [vmem:[%s467_s5 + $0x10] sm:$0xff] }
   0x8   :  { %v299_v58 = vld [vmem:[%s467_s5 + $0x8] sm:$0xff]  ;;  %v312_v59 = vld [vmem:[%s466_s4] ss:$0 sm:$0xff] }
   0x9   :  { %v298_v60 = vld [vmem:[%s467_s5] sm:$0xff] }
   0xa   :  { %125 = vmatpush.bf16.msra.mxu0 %v296_v23  ;;  %220 = vmatpush.bf16.msra.mxu1 %v304_v53 }
   0xb   :  { %37 = vadd.xlane.f32.xlu0 %v36_v3  ;;  %v315_v5 = vpop.eup %314 }
   0xc   :  { %v40_v6 = vmul.f32 32.0, %v315_v5  ;;  %vm44_vm1 = vweird.f32 %v315_v5 }
   0xe   :  { %v41_v7 = vsub.f32 1.0, %v40_v6  ;;  %221 = vmatpush.bf16.msra.mxu1 %v303_v54 }
  0x10   :  { %v42_v8 = vmul.f32 %v315_v5, %v41_v7 }
  0x12   :  { %v43_v9 = vadd.f32 %v315_v5, %v42_v8  ;;  %222 = vmatpush.bf16.msra.mxu1 %v302_v55 }
  0x14   :  { %v45_v10 = vsel %vm44_vm1, %v315_v5, %v43_v9 }
  0x16   :  { %223 = vmatpush.bf16.msra.mxu1 %v301_v56 }
  0x1a   :  { %224 = vmatpush.bf16.msra.mxu1 %v300_v57 }
  0x1e   :  { %225 = vmatpush.bf16.msra.mxu1 %v299_v58 }
  0x22   :  { %226 = vmatpush.bf16.msra.mxu1 %v298_v60 }
  0x76   :  { %v35_v11 = vpop.xlane.xlu0 %34 }
  0x77   :  { %v46_v12 = vmul.f32 %v45_v10, %v35_v11 }
  0x79   :  { %v48_v13 = vsub.f32 %v397_v0, %v46_v12 }
  0x7b   :  { %v50_v14 = vmul.f32 %v48_v13, %v48_v13 }
  0x7d   :  { %v52_v15 = vsel %vm32_vm0, %v50_v14, 0.0 }
  0x7e   :  { %53 = vadd.xlane.f32.xlu1 %v52_v15  ;;  %v38_v16 = vpop.xlane.xlu0 %37 }
  0x7f   :  { %v47_v17 = vmul.f32 %v45_v10, %v38_v16 }
  0x81   :  { %v49_v18 = vsub.f32 %v404_v2, %v47_v17 }
  0x83   :  { %v51_v19 = vmul.f32 %v49_v18, %v49_v18 }
  0x85   :  { %v55_v20 = vsel %vm32_vm0, %v51_v19, 0.0 }
  0x86   :  { %56 = vadd.xlane.f32.xlu1 %v55_v20 }
  0xf1   :  { %v54_v22 = vpop.xlane.xlu1 %53 }
  0xf2   :  { %v58_v24 = vmul.f32 %v54_v22, %v45_v10  ;;  %v313_v22 = vld [vmem:[%s468_s6] ss:$0 sm:$0xff]  ;;  %s352_s6 = smov 128  }
  0xf4   :  { %v60_v25 = vadd.f32 1e-05, %v58_v24 }
  0xf6   :  { %316 = vrsqrt.f32 %v60_v25  ;;  %vm68_vm3 = vweird.f32 %v60_v25 }
  0xf9   :  { %v57_v26 = vpop.xlane.xlu1 %56 }
  0xfa   :  { %v59_v27 = vmul.f32 %v57_v26, %v45_v10 }
  0xfc   :  { %v317_v28 = vpop.eup %316  ;;  %v61_v29 = vadd.f32 1e-05, %v59_v27 }
  0xfd   :  { %v63_v30 = vmul.f32 %v317_v28, %v60_v25  ;;  %vm69_vm2 = vweird.f32 %v317_v28 }
  0xfe   :  { %318 = vrsqrt.f32 %v61_v29  ;;  %vm70_vm4 = vmor %vm68_vm3, %vm69_vm2  ;;  %vm78_vm6 = vweird.f32 %v61_v29 }
  0xff   :  { %v64_v31 = vmul.f32 %v317_v28, %v63_v30 }
 0x101   :  { %v65_v32 = vmul.f32 0.5, %v64_v31 }
 0x103   :  { %v66_v33 = vsub.f32 1.5, %v65_v32 }
 0x104   :  { %v319_v34 = vpop.eup %318 }
 0x105   :  { %v67_v35 = vmul.f32 %v317_v28, %v66_v33  ;;  %v73_v36 = vmul.f32 %v319_v34, %v61_v29  ;;  %vm79_vm5 = vweird.f32 %v319_v34 }
 0x106   :  { %vm80_vm7 = vmor %vm78_vm6, %vm79_vm5 }
 0x107   :  { %v74_v37 = vmul.f32 %v319_v34, %v73_v36  ;;  %v71_v38 = vsel %vm70_vm4, %v317_v28, %v67_v35 }
 0x108   :  { %v82_v41 = vmul.f32 %v71_v38, %v48_v13 }
 0x109   :  { %v75_v39 = vmul.f32 0.5, %v74_v37 }
 0x10a   :  { %v87_v46 = vmul.f32 %v310_v42, %v82_v41 }
 0x10b   :  { %v76_v40 = vsub.f32 1.5, %v75_v39 }
 0x10c   :  { %v92_v49 = vadd.f32 %v311_v47, %v87_v46 }
 0x10d   :  { %v77_v43 = vmul.f32 %v319_v34, %v76_v40 }
 0x10f   :  { %v81_v44 = vsel %vm80_vm7, %v319_v34, %v77_v43 }
 0x110   :  { %v83_v45 = vmul.f32 %v81_v44, %v49_v18 }
 0x112   :  { %v88_v48 = vmul.f32 %v310_v42, %v83_v45 }
 0x114   :  { %v93_v50 = vadd.f32 %v311_v47, %v88_v48 }
 0x116   :  { %v94_v51 = vpack.c.bf16 %v93_v50, %v92_v49 }
 0x118   :  { %263 = vmatmul.msk.bf16.vlgmr.msra.gmra.mxu0 %vm32_vm0, %v94_v51 }
 0x195   :  { %v127_v61 = vpop.f32.mrf.mxu0 }
 0x196   :  { %v128_v62 = vadd.f32 %v312_v59, %v127_v61 }
 0x198   :  { %v132_v63 = vmul.f32 %v128_v62, %v128_v62 }
 0x19a   :  { %v134_v1 = vmul.f32 %v132_v63, %v128_v62 }
 0x19c   :  { %v136_v3 = vmul.f32 0.044715, %v134_v1 }
 0x19d   :  { %v129_v4 = vpop.f32.mrf.mxu0 }
 0x19e   :  { %v138_v5 = vadd.f32 %v136_v3, %v128_v62  ;;  %v130_v6 = vadd.f32 %v312_v59, %v129_v4 }
 0x1a0   :  { %v133_v7 = vmul.f32 %v130_v6, %v130_v6  ;;  %v140_v8 = vmul.f32 0.7978846, %v138_v5 }
 0x1a2   :  { %v135_v9 = vmul.f32 %v133_v7, %v130_v6  ;;  %320 = vtanh.f32 %v140_v8 }
 0x1a4   :  { %v137_v10 = vmul.f32 0.044715, %v135_v9 }
 0x1a6   :  { %v139_v11 = vadd.f32 %v137_v10, %v130_v6 }
 0x1a8   :  { %v141_v12 = vmul.f32 0.7978846, %v139_v11  ;;  %v321_v13 = vpop.eup %320 }
 0x1a9   :  { %v144_v14 = vadd.f32 1.0, %v321_v13 }
 0x1aa   :  { %322 = vtanh.f32 %v141_v12 }
 0x1ab   :  { %v146_v17 = vmul.f32 0.5, %v144_v14 }
 0x1ad   :  { %v148_v19 = vmul.f32 %v146_v17, %v128_v62 }
 0x1b0   :  { %v323_v15 = vpop.eup %322 }
 0x1b1   :  { %v145_v16 = vadd.f32 1.0, %v323_v15 }
 0x1b3   :  { %v147_v18 = vmul.f32 0.5, %v145_v16 }
 0x1b5   :  { %v149_v20 = vmul.f32 %v147_v18, %v130_v6 }
 0x1b7   :  { %v150_v21 = vpack.c.bf16 %v149_v20, %v148_v19 }
 0x1b9   :  { %227 = vmatmul.bf16.vlgmr.msra.gmra.mxu1 %v150_v21 }
 0x236   :  { %v228_v23 = vpop.f32.mrf.mxu1 }
 0x237   :  { %v229_v24 = vadd.f32 %v313_v22, %v228_v23 }
 0x239   :  { %v233_v25 = vadd.f32 %v229_v24, %v397_v0 }
 0x23b   :  { %235 = vst.msk [vmem:[#allocation2] sm:$0xff] %vm32_vm0, %v233_v25 }
 0x23e   :  { %v230_v26 = vpop.f32.mrf.mxu1 }
 0x23f   :  { %v231_v27 = vadd.f32 %v313_v22, %v230_v26 }
 0x241   :  { %v234_v28 = vadd.f32 %v231_v27, %v404_v2 }
 0x243   :  { %236 = vst.msk [vmem:[#allocation2 + $0x8] sm:$0xff] %vm32_vm0, %v234_v28 }
 0x244   :  { %249 = dma.vmem_to_hbm [thread:$0]  %s242_s0, 256, %s244_s30, [#allocation3], %s352_s6, %s352_s6, %s353_s3  }
 0x245   :  { %348 = dma.done.wait [#allocation3], 256  }
 0x246   :  { %349 = vsyncadd [#allocation3], 4294967040 }
 0x247   :  { %254 = vsyncpa [#allocation3], 1 }

// kernel: gpt2_block_forward.2
= control target key start
LH: loop header
LB: loop body
LE: loop exit
PB: predicated region body
PF: predicated region fallthrough
CT: control target
= control target key end

     0   :  { %s854_s24 = smov 0   ;;  %s856_s25 = smov 0   ;;  %s968_s0 = inlined_call_operand.vmem [shape: f32[2,8,32], index: 0, kind: input, shape index: {}]   ;;  %s969_s1 = inlined_call_operand.vmem [shape: f32[1,32], index: 1, kind: input, shape index: {}]   ;;  %s970_s2 = inlined_call_operand.vmem [shape: f32[1,32], index: 2, kind: input, shape index: {}]   ;;  %s971_s3 = inlined_call_operand.vmem [shape: bf16[32,96], index: 3, kind: input, shape index: {}]   ;;  %s972_s4 = inlined_call_operand.vmem [shape: f32[1,96], index: 4, kind: input, shape index: {}]   ;;  %s973_s5 = inlined_call_operand.vmem [shape: bf16[32,32], index: 5, kind: input, shape index: {}]   ;;  %s974_s6 = inlined_call_operand.vmem [shape: f32[1,32], index: 6, kind: input, shape index: {}]   ;;  %s975_s7 = inlined_call_operand.vmem [shape: f32[2,8,32], index: 7, kind: output, shape index: {}]  }
   0x1   :  { %s858_s26 = smov 0   ;;  %s860_s27 = smov 0  }
   0x2   :  { %s862_s28 = smov 0  }
   0x3 LB: > { %s26_s29 = sadd.s32 1, %s788_s26  ;;  %s29_s30 = sadd.s32 1, %s792_s27  ;;  %s796_s28 = sphi %s862_s28, %s17_s28   ;;  %s792_s27 = sphi %s860_s27, %s979_s27   ;;  %s788_s26 = sphi %s858_s26, %s978_s26   ;;  %s784_s25 = sphi %s856_s25, %s977_s25   ;;  %s780_s24 = sphi %s854_s24, %s976_s24  }
   0x4   : > { %p27_p0 = scmp.ge.s32.totalorder %s26_s29, 4  ;;  %p651_p1 = scmp.ge.s32.totalorder %s796_s28, 1 }
   0x5   : > { %p248_p2 = scmp.lt.s32.totalorder %s796_s28, 9 }
   0x6   : > { %s981_s29 = smov (%p27_p0, %s26_s29), 0  ;;  %s983_s30 = smov (!%p27_p0, %s29_s30), %s792_s27 }
   0x7   : > { %p249_p3 = pnand %p651_p1, %p248_p2  ;;  %p31_p4 = scmp.ge.s32.totalorder %s983_s30, 2 }
   0x8   : > { %p278_p5 = scmp.lt.s32.totalorder (!%p249_p3), %s784_s25, 1  ;;  %p654_p6 = scmp.ne.s32.totalorder (!%p249_p3), %s780_s24, 0 }
   0x9   : > { %s985_s30 = smov (%p31_p4, %s983_s30), 0  ;;  %252 = sbr.rel (%p249_p3) target bundleno = 1243 (0x4db), region = 48 }
   0xe   : > { %s987_s25 = smov (!%p278_p5, %s784_s25), 1  ;;  %290 = sbr.rel (%p654_p6) target bundleno = 569 (0x239), region = 52 }
   0xf   : > { %s652_s8 = sshll.u32 %s987_s25, 3  ;;  %s801_s9 = smov (!%p654_p6), 120  }
  0x10   : > { %s889_s11 = scalar_lea.vmem %s968_s0, %s652_s8  ;;  %s894_s14 = scalar_lea.vmem %s975_s7, %s652_s8 }
  0x11   : > { %s800_s8 = smov (!%p654_p6), 56   ;;  %s802_s10 = smov (!%p654_p6), 96  }
  0x12   : > { %s803_s12 = smov (!%p654_p6), 88   ;;  %s804_s13 = smov (!%p654_p6), 64  }
  0x13   : > { %v299_v0 = vld [vmem:[%s889_s11] sm:$0xff]  ;;  %vm302_vm0 = vcmask 261120   ;;  %v798_v2 = vmov 32.0   ;;  %v291_v14 = vlaneseq  ;;  %v683_v15 = vld [vmem:[%s971_s3 + $0x8] sm:$0xff]  ;;  %vm297_vm2 = vcmask 64512   ;;  %s805_s15 = smov 80  }
  0x14   : > { %v303_v1 = vsel %vm302_vm0, %v299_v0, 0.0  ;;  %749 = vrcp.f32 %v798_v2  ;;  %370 = vmatpush.bf16.msra.mxu0 %v683_v15  ;;  %v682_v18 = vld [vmem:[%s971_s3] sm:$0xff]  ;;  %v799_v19 = vmov -1e+30   ;;  %vm378_vm7 = vcmask 60416   ;;  %s806_s16 = smov 112  }
  0x15   : > { %304 = vadd.xlane.f32.xlu0 %v303_v1  ;;  %v292_v16 = vshrl.u32 %v291_v14, 7  ;;  %v294_v17 = vand.u32 127, %v291_v14  ;;  %v746_v30 = vld [vmem:[%s969_s1] ss:$0 sm:$0xff]  ;;  %s807_s17 = smov 104   ;;  %s808_s18 = smov 48  }
  0x16   : > { %v747_v33 = vld [vmem:[%s970_s2] ss:$0 sm:$0xff]  ;;  %s809_s19 = smov 40   ;;  %s810_s20 = smov 72  }
  0x17   : > { %vm295_vm3 = vcmp.le.s32.totalorder %v294_v17, %v292_v16  ;;  %v748_v37 = vld [vmem:[%s972_s4] ss:$0 sm:$0xff] }
  0x18   : > { %v296_v20 = vsel %vm295_vm3, 0.0, %v799_v19  ;;  %371 = vmatpush.bf16.msra.mxu0 %v682_v18 }
  0x19   : > { %298 = vst.msk [vmem:[#allocation6] sm:$0xff] %vm297_vm2, %v296_v20 }
  0x1a   : > { %v750_v3 = vpop.eup %749 }
  0x1b   : > { %v307_v4 = vmul.f32 32.0, %v750_v3  ;;  %vm311_vm1 = vweird.f32 %v750_v3 }
  0x1d   : > { %v308_v5 = vsub.f32 1.0, %v307_v4 }
  0x1f   : > { %v309_v6 = vmul.f32 %v750_v3, %v308_v5 }
  0x21   : > { %v310_v7 = vadd.f32 %v750_v3, %v309_v6 }
  0x23   : > { %v312_v8 = vsel %vm311_vm1, %v750_v3, %v310_v7 }
  0x88   : > { %v305_v9 = vpop.xlane.xlu0 %304 }
  0x89   : > { %v313_v10 = vmul.f32 %v312_v8, %v305_v9 }
  0x8b   : > { %v314_v11 = vsub.f32 %v299_v0, %v313_v10 }
  0x8d   : > { %v315_v12 = vmul.f32 %v314_v11, %v314_v11 }
  0x8f   : > { %v316_v13 = vsel %vm302_vm0, %v315_v12, 0.0 }
  0x90   : > { %317 = vadd.xlane.f32.xlu0 %v316_v13 }
 0x103   : > { %v318_v21 = vpop.xlane.xlu0 %317 }
 0x104   : > { %v319_v22 = vmul.f32 %v318_v21, %v312_v8 }
 0x106   : > { %v320_v23 = vadd.f32 1e-05, %v319_v22 }
 0x108   : > { %751 = vrsqrt.f32 %v320_v23  ;;  %vm327_vm5 = vweird.f32 %v320_v23 }
 0x10e   : > { %v752_v24 = vpop.eup %751 }
 0x10f   : > { %v322_v25 = vmul.f32 %v752_v24, %v320_v23  ;;  %vm328_vm4 = vweird.f32 %v752_v24 }
 0x110   : > { %vm329_vm6 = vmor %vm327_vm5, %vm328_vm4 }
 0x111   : > { %v323_v26 = vmul.f32 %v752_v24, %v322_v25 }
 0x113   : > { %v324_v27 = vmul.f32 0.5, %v323_v26 }
 0x115   : > { %v325_v28 = vsub.f32 1.5, %v324_v27 }
 0x117   : > { %v326_v29 = vmul.f32 %v752_v24, %v325_v28 }
 0x119   : > { %v330_v31 = vsel %vm329_vm6, %v752_v24, %v326_v29 }
 0x11a   : > { %v331_v32 = vmul.f32 %v330_v31, %v314_v11 }
 0x11c   : > { %v335_v34 = vmul.f32 %v746_v30, %v331_v32 }
 0x11e   : > { %v339_v35 = vadd.f32 %v747_v33, %v335_v34 }
 0x120   : > { %v340_v36 = vpack.c.bf16 %v339_v35, %v339_v35 }
 0x122   : > { %663 = vmatmul.msk.bf16.vlgmr.msra.gmra.mxu0 %vm302_vm0, %v340_v36 }
 0x19f   : > { %v373_v38 = vpop.f32.mrf.mxu0 }
 0x1a0   : > { %v374_v39 = vadd.f32 %v748_v37, %v373_v38 }
 0x1a2   : > { %v377_v40 = vpack.c.bf16 %v374_v39, %v374_v39 }
 0x1a4   : > { %399 = vrot.lane.b32.xlu0 %v377_v40, %s800_s8  ;;  %389 = vrot.lane.b32.xlu2 %v377_v40, %s801_s9  ;;  %379 = vst.msk [vmem:[#allocation2] sm:$0xf] %vm378_vm7, %v377_v40 }
 0x1a5   : > { %381 = vrot.lane.b32.xlu1 %v377_v40, %s802_s10 }
 0x1a7   : > { %v375_v41 = vpop.f32.mrf.mxu0 }
 0x1ac   : > { %394 = vrot.lane.b32.xlu2 %v377_v40, %s803_s12 }
 0x1ad   : > { %385 = vrot.lane.b32.xlu1 %v377_v40, %s804_s13 }
 0x1b4   : > { %409 = vrot.lane.b32.xlu2 %v377_v40, %s805_s15 }
 0x1b5   : > { %404 = vrot.lane.b32.xlu1 %v377_v40, %s806_s16 }
 0x1bc   : > { %419 = vrot.lane.b32.xlu2 %v377_v40, %s807_s17 }
 0x1bd   : > { %414 = vrot.lane.b32.xlu1 %v377_v40, %s808_s18 }
 0x1c4   : > { %429 = vrot.lane.b32.xlu2 %v377_v40, %s809_s19 }
 0x1c5   : > { %424 = vrot.lane.b32.xlu1 %v377_v40, %s810_s20 }
 0x1fe   : > { %v390_v42 = vpop.permute.xlu2 %389 }
 0x1ff   : > { %393 = vst.msk [vmem:[#allocation2 + $0x4] sm:$0xf] %vm378_vm7, %v390_v42 }
 0x206   : > { %v395_v43 = vpop.permute.xlu2 %394 }
 0x207   : > { %398 = vst.msk [vmem:[#allocation3 + $0x4] sm:$0xf] %vm378_vm7, %v395_v43 }
 0x20e   : > { %v410_v44 = vpop.permute.xlu2 %409 }
 0x20f   : > { %413 = vst.msk [vmem:[#allocation3 + $0x8] sm:$0xf] %vm378_vm7, %v410_v44 }
 0x216   : > { %v400_v45 = vpop.permute.xlu0 %399  ;;  %v420_v46 = vpop.permute.xlu2 %419 }
 0x217   : > { %403 = vst.msk [vmem:[#allocation4 + $0x4] sm:$0xf] %vm378_vm7, %v400_v45  ;;  %v382_v47 = vpop.permute.xlu1 %381 }
 0x218   : > { %423 = vst.msk [vmem:[#allocation2 + $0xc] sm:$0xf] %vm378_vm7, %v420_v46 }
 0x219   : > { %384 = vst.msk [vmem:[#allocation3] sm:$0xf] %vm378_vm7, %v382_v47 }
 0x21e   : > { %v430_v48 = vpop.permute.xlu2 %429 }
 0x21f   : > { %433 = vst.msk [vmem:[#allocation4 + $0xc] sm:$0xf] %vm378_vm7, %v430_v48  ;;  %v386_v49 = vpop.permute.xlu1 %385 }
 0x220   : > { %388 = vst.msk [vmem:[#allocation4] sm:$0xf] %vm378_vm7, %v386_v49 }
 0x227   : > { %v405_v50 = vpop.permute.xlu1 %404 }
 0x228   : > { %408 = vst.msk [vmem:[#allocation2 + $0x8] sm:$0xf] %vm378_vm7, %v405_v50 }
 0x22f   : > { %v415_v51 = vpop.permute.xlu1 %414 }
 0x230   : > { %418 = vst.msk [vmem:[#allocation4 + $0x8] sm:$0xf] %vm378_vm7, %v415_v51 }
 0x237   : > { %v425_v52 = vpop.permute.xlu1 %424 }
 0x238   : > { %428 = vst.msk [vmem:[#allocation3 + $0xc] sm:$0xf] %vm378_vm7, %v425_v52 }
 0x239 PF: > { %s929_s21 = sshll.u32 %s780_s24, 2  ;;  %vm444_vm8 = vcmask 64512   ;;  %v443_v56 = vld [vmem:[#allocation6] sm:$0xff]  ;;  %vm477_vm9 = vcmask 1043456   ;;  %vm499_vm10 = vcmask 60416   ;;  %p670_p7 = scmp.ne.s32.totalorder %s780_s24, 3 }
 0x23a   : > { %s438_s22 = scalar_lea.vmem [#allocation3], %s929_s21  ;;  %s435_s23 = scalar_lea.vmem [#allocation2], %s929_s21 }
 0x23b   : > { %v436_v55 = vld [vmem:[%s435_s23] sm:$0xf]  ;;  %s441_s25 = scalar_lea.vmem [#allocation4], %s929_s21  ;;  %s498_s8 = scalar_lea.vmem [#allocation5], %s929_s21 }
 0x23c   : > { %v442_v61 = vld [vmem:[%s441_s25] sm:$0xf]  ;;  %s811_s9 = smov (!%p670_p7), 8   ;;  %s812_s10 = smov (!%p670_p7), 24  }
 0x23d   : > { %v479_v62 = vsel %vm477_vm9, %v442_v61, 0  ;;  %s813_s12 = smov (!%p670_p7), 16  }
 0x23e   : > { %488 = vmatpush.bf16.msra.mxu1 %v479_v62 }
 0x23f   : > { %v439_v53 = vld [vmem:[%s438_s22] sm:$0xf] }
 0x240   : > { %v449_v54 = vsel %vm444_vm8, %v439_v53, 0 }
 0x241   : > { %458 = vmatpush.bf16.xpose.msra.mxu0 %v449_v54 }
 0x248   : > { %667 = vmatmul.msk.bf16.vlgmr.msra.gmra.mxu0 %vm444_vm8, %v436_v55 }
 0x2c5   : > { %v460_v57 = vpop.f32.mrf.mxu0 }
 0x2c6   : > { %v461_v58 = vadd.f32 %v460_v57, %v443_v56 }
 0x2c8   : > { %v464_v59 = vsel %vm444_vm8, %v461_v58, -inf }
 0x2c9   : > { %465 = vmax.xlane.f32.xlu0 %v464_v59 }
 0x2cd   : > { %v462_v60 = vpop.f32.mrf.mxu0 }
 0x33c   : > { %v466_v63 = vpop.xlane.xlu0 %465 }
 0x33d   : > { %v467_v0 = vsub.f32 %v461_v58, %v466_v63 }
 0x33f   : > { %v468_v1 = vmul.f32 1.442695, %v467_v0 }
 0x341   : > { %753 = vpow2.f32 %v468_v1 }
 0x347   : > { %v754_v2 = vpop.eup %753 }
 0x348   : > { %v470_v3 = vsel %vm444_vm8, %v754_v2, 0.0  ;;  %v473_v4 = vpack.c.bf16 %v754_v2, %v754_v2 }
 0x349   : > { %471 = vadd.xlane.f32.xlu0 %v470_v3 }
 0x34a   : > { %668 = vmatmul.msk.bf16.vlgmr.msra.gmra.mxu1 %vm444_vm8, %v473_v4 }
 0x3bc   : > { %v472_v5 = vpop.xlane.xlu0 %471 }
 0x3bd   : > { %755 = vrcp.f32 %v472_v5 }
 0x3c3   : > { %v756_v6 = vpop.eup %755 }
 0x3c7   : > { %v490_v7 = vpop.f32.mrf.mxu1 }
 0x3c8   : > { %v495_v8 = vmul.f32 %v756_v6, %v490_v7 }
 0x3ca   : > { %v496_v9 = vpack.c.bf16 %v495_v8, %v495_v8 }
 0x3cb   : > { %504 = sbr.rel (%p670_p7) target bundleno = 1243 (0x4db), region = 56 }
 0x3cc   : > { %500 = vst.msk [vmem:[%s498_s8] sm:$0xf] %vm499_vm10, %v496_v9 }
 0x3cf   : > { %v492_v10 = vpop.f32.mrf.mxu1 }
 0x3d0   : > { %v685_v19 = vld [vmem:[%s973_s5 + $0x8] sm:$0xff]  ;;  %v684_v20 = vld [vmem:[%s973_s5] sm:$0xff]  ;;  %vm530_vm11 = vcmask 130048   ;;  %vm533_vm12 = vcmask 195584   ;;  %vm556_vm13 = vcmask 261120  }
 0x3d1   : > { %565 = vmatpush.bf16.msra.mxu0 %v685_v19  ;;  %v757_v28 = vld [vmem:[%s974_s6] ss:$0 sm:$0xff] }
 0x3d2   : > { %v572_v30 = vld [vmem:[%s889_s11] sm:$0xff] }
 0x3d3   : > { %v507_v11 = vld [vmem:[#allocation5 + $0x4] sm:$0xf]  ;;  %v687_v12 = vld [vmem:[#allocation5 + $0x8] sm:$0xff]   ;;  %v505_v22 = vld [vmem:[#allocation5] sm:$0xf] }
 0x3d4   : > { %v513_v13 = vunpack.c.l.b16 %v507_v11  ;;  %v689_v14 = vunpack.c.h.b16 %v687_v12  ;;  %v688_v17 = vunpack.c.l.b16 %v687_v12 }
 0x3d5   : > { %566 = vmatpush.bf16.msra.mxu0 %v684_v20 }
 0x3d6   : > { %v514_v15 = vpack.c.b16 %v513_v13, %v513_v13  ;;  %v524_v16 = vpack.c.b16 %v689_v14, %v689_v14  ;;  %v519_v18 = vpack.c.b16 %v688_v17, %v688_v17 }
 0x3d8   : > { %515 = vrot.lane.b32.xlu0 %v514_v15, %s811_s9  ;;  %525 = vrot.lane.b32.xlu1 %v524_v16, %s812_s10 }
 0x3e0   : > { %520 = vrot.lane.b32.xlu0 %v519_v18, %s813_s12 }
 0x44a   : > { %v516_v21 = vpop.permute.xlu0 %515  ;;  %v526_v23 = vpop.permute.xlu1 %525 }
 0x44b   : > { %v529_v24 = vsel %vm444_vm8, %v505_v22, %v516_v21 }
 0x452   : > { %v521_v25 = vpop.permute.xlu0 %520 }
 0x453   : > { %v532_v26 = vsel %vm530_vm11, %v529_v24, %v521_v25 }
 0x454   : > { %v535_v27 = vsel %vm533_vm12, %v532_v26, %v526_v23 }
 0x455   : > { %679 = vmatmul.msk.bf16.vlgmr.msra.gmra.mxu0 %vm556_vm13, %v535_v27 }
 0x4d2   : > { %v568_v29 = vpop.f32.mrf.mxu0 }
 0x4d3   : > { %v569_v31 = vadd.f32 %v757_v28, %v568_v29 }
 0x4d5   : > { %v573_v32 = vadd.f32 %v572_v30, %v569_v31 }
 0x4d7   : > { %574 = vst.msk [vmem:[%s894_s14] sm:$0xff] %vm556_vm13, %v573_v32 }
 0x4da   : > { %v570_v33 = vpop.f32.mrf.mxu0 }
 0x4db PF: > { %s17_s28 = sadd.s32 1, %s796_s28   ;;  %s976_s24 = smov %s788_s26 }
 0x4dc   : > { %p14_p8 = scmp.ge.s32.totalorder %s17_s28, 10   ;;  %s977_s25 = smov %s792_s27 }
 0x4dd   : > { %s978_s26 = smov %s981_s29  ;;  %s979_s27 = smov %s985_s30 }
 0x4de   :  { %16 = sbr.rel (!%p14_p8) target bundleno = 3 (0x3), region = 102 }

</bundles_post_ra>
